<compile_context>
chip_gen: v7x
topology: tpu7x:2x2x1
jax: 0.10.0
libtpu: 0.0.40
codegen_flags: <defaults>
</compile_context>

<pallas_src>
import functools

import jax
import jax.numpy as jnp
from jax.experimental import pallas as pl
from jax.experimental.pallas import tpu as pltpu

TOL = 1e-18


def ard_vd_linear_kernel(alpha_ref, x_ref, wt_ref, wtsq_ref, b_ref, noise_ref,
                         o_ref, mean_acc, var_acc):
    k = pl.program_id(2)

    @pl.when(k == 0)
    def _init():
        mean_acc[...] = jnp.zeros_like(mean_acc)
        var_acc[...] = jnp.zeros_like(var_acc)

    x = x_ref[...].astype(jnp.float32)                       # (tm, tk)
    mean_acc[...] += jnp.dot(x, wt_ref[...],
                             preferred_element_type=jnp.float32)
    # x*x is cheap (tm x tk VPU mul); W^2 comes precomputed from HBM.
    var_acc[...] += jnp.dot(x * x, wtsq_ref[...],
                            preferred_element_type=jnp.float32)

    @pl.when(k == pl.num_programs(2) - 1)
    def _finalize():
        alpha = alpha_ref[0]                                  # scalar from SMEM
        b = b_ref[...].astype(jnp.float32)                    # (1, tn)
        mean = mean_acc[...] + b
        var = alpha * (var_acc[...] + b * b)
        o_ref[...] = (mean + jnp.sqrt(var + TOL) * noise_ref[...]).astype(o_ref.dtype)


def _round_up(a, m):
    return (a + m - 1) // m * m


@functools.partial(jax.jit, static_argnames=("seed", "tm", "tn", "tk"))
def ard_vd_linear(x, weight, bias, log_alpha, seed, *, tm=None, tn=None, tk=None):
    """x: (..., K) f32, weight: (N, K) f32, bias: (N,) f32, log_alpha: (1,) f32."""
    orig_shape = x.shape
    K = orig_shape[-1]
    x2d = jnp.asarray(x, jnp.float32).reshape(-1, K)
    M = x2d.shape[0]
    N, K2 = weight.shape
    assert K == K2

    # Big, aligned tiles; capped so VMEM stays bounded on all generations
    # (worst case ~8 MiB of VMEM incl. double buffering, well under the
    #  32 MiB default scoped limit and v7x's 64 MiB physical VMEM).
    tm = tm or min(_round_up(M, 8), 256)
    tn = tn or min(_round_up(N, 128), 512)
    tk = tk or min(_round_up(K, 128), 512)

    Mp, Np, Kp = _round_up(M, tm), _round_up(N, tn), _round_up(K, tk)

    xp = jnp.pad(x2d, ((0, Mp - M), (0, Kp - K)))
    wt = jnp.pad(jnp.asarray(weight, jnp.float32).T, ((0, Kp - K), (0, Np - N)))
    wtsq = wt * wt                                            # squared once, not per grid step
    bp = jnp.pad(jnp.asarray(bias, jnp.float32), (0, Np - N)).reshape(1, Np)
    alpha = jnp.exp(jnp.asarray(log_alpha, jnp.float32).reshape(1))

    # Standard-normal noise (replaces torch.randn_like). Generated outside the
    # kernel: keeps the kernel free of EUP-heavy Box-Muller work and avoids the
    # TPU-only in-kernel PRNG primitives.
    noise = jax.random.normal(jax.random.PRNGKey(seed), (Mp, Np), dtype=jnp.float32)

    grid = (Mp // tm, Np // tn, Kp // tk)

    out = pl.pallas_call(
        ard_vd_linear_kernel,
        out_shape=jax.ShapeDtypeStruct((Mp, Np), jnp.float32),
        grid=grid,
        in_specs=[
            pl.BlockSpec(memory_space=pltpu.MemorySpace.SMEM),   # alpha scalar
            pl.BlockSpec((tm, tk), lambda i, j, k: (i, k)),      # x tile
            pl.BlockSpec((tk, tn), lambda i, j, k: (k, j)),      # W^T tile
            pl.BlockSpec((tk, tn), lambda i, j, k: (k, j)),      # (W^T)^2 tile
            pl.BlockSpec((1, tn), lambda i, j, k: (0, j)),       # bias tile
            pl.BlockSpec((tm, tn), lambda i, j, k: (i, j)),      # noise tile
        ],
        out_specs=pl.BlockSpec((tm, tn), lambda i, j, k: (i, j)),
        scratch_shapes=[
            pltpu.VMEM((tm, tn), jnp.float32),                   # mean accumulator
            pltpu.VMEM((tm, tn), jnp.float32),                   # x^2 @ W^2 accumulator
        ],
        compiler_params=pltpu.CompilerParams(
            dimension_semantics=("parallel", "parallel", "arbitrary")),
    )(alpha, xp, wt, wtsq, bp, noise)

    out = out[:M, :N]
    return out.reshape(*orig_shape[:-1], N)


if __name__ == "__main__":
    key = jax.random.PRNGKey(0)
    kw, ka, kx = jax.random.split(key, 3)

    in_features, out_features, batch = 32, 32, 8

    # Deterministic parameter init matching reset_parameters():
    weight = 0.02 * jax.random.normal(kw, (out_features, in_features), dtype=jnp.float32)
    bias = jnp.zeros((out_features,), dtype=jnp.float32)            # bias zeroed
    log_alpha = jax.random.normal(ka, (1,), dtype=jnp.float32)      # randn(1)

    x = jax.random.normal(kx, (batch, in_features), dtype=jnp.float32)

    out = ard_vd_linear(x, weight, bias, log_alpha, seed=1234)
    out = jax.block_until_ready(out)

    assert out.shape == (batch, out_features)
    assert bool(jnp.all(jnp.isfinite(out)))

    # Sanity: output must lie within a few std-devs of the analytic mean.
    mean_ref = x @ weight.T + bias
    var_ref = jnp.exp(log_alpha[0]) * ((x * x) @ (weight * weight).T + bias * bias)
    assert bool(jnp.all(jnp.abs(out - mean_ref) <= 8.0 * jnp.sqrt(var_ref + TOL) + 1e-4))

    print("KERNEL_OK")
</pallas_src>

<mosaic_0001>
module attributes {stable_mosaic.version = 11 : i64} {
  func.func @ard_vd_linear_kernel(%arg0: i32, %arg1: i32, %arg2: i32, %arg3: memref<1xf32, #tpu.memory_space<smem>>, %arg4: memref<8x128xf32, #tpu.memory_space<vmem>>, %arg5: memref<128x128xf32, #tpu.memory_space<vmem>>, %arg6: memref<128x128xf32, #tpu.memory_space<vmem>>, %arg7: memref<1x128xf32, #tpu.memory_space<vmem>>, %arg8: memref<8x128xf32, #tpu.memory_space<vmem>>, %arg9: memref<8x128xf32, #tpu.memory_space<vmem>>, %arg10: memref<8x128xf32, #tpu.memory_space<vmem>>, %arg11: memref<8x128xf32, #tpu.memory_space<vmem>>) attributes {dimension_semantics = [#tpu.dimension_semantics<parallel>, #tpu.dimension_semantics<parallel>, #tpu.dimension_semantics<arbitrary>], iteration_bounds = array<i64: 1, 1, 1>, scalar_prefetch = 0 : i64, scratch_operands = 2 : i64, tpu.core_type = #tpu.core_type<tc>, window_params = [{transform_indices = @transform_0, window_bounds = array<i64: 1>}, {transform_indices = @transform_1, window_bounds = array<i64: 8, 128>}, {transform_indices = @transform_2, window_bounds = array<i64: 128, 128>}, {transform_indices = @transform_3, window_bounds = array<i64: 128, 128>}, {transform_indices = @transform_4, window_bounds = array<i64: 1, 128>}, {transform_indices = @transform_5, window_bounds = array<i64: 8, 128>}, {transform_indices = @transform_6, window_bounds = array<i64: 8, 128>}]} {
    %c0_i32 = arith.constant 0 : i32
    %0 = arith.cmpi eq, %arg2, %c0_i32 : i32
    %1 = arith.extui %0 : i1 to i32
    %c0_i32_0 = arith.constant 0 : i32
    %2 = arith.cmpi ne, %1, %c0_i32_0 : i32
    scf.if %2 {
      %cst_17 = arith.constant 0.000000e+00 : f32
      %18 = vector.broadcast %cst_17 : f32 to vector<8x128xf32>
      %c0_18 = arith.constant 0 : index
      %c0_19 = arith.constant 0 : index
      %19 = vector.load %arg10[%c0_18, %c0_19] : memref<8x128xf32, #tpu.memory_space<vmem>>, vector<8x128xf32>
      tpu.vector_store %arg10[%c0_18, %c0_19], %18 {strides = array<i32>} : memref<8x128xf32, #tpu.memory_space<vmem>>, vector<8x128xf32>,
      %cst_20 = arith.constant 0.000000e+00 : f32
      %20 = vector.broadcast %cst_20 : f32 to vector<8x128xf32>
      %c0_21 = arith.constant 0 : index
      %c0_22 = arith.constant 0 : index
      %21 = vector.load %arg11[%c0_21, %c0_22] : memref<8x128xf32, #tpu.memory_space<vmem>>, vector<8x128xf32>
      tpu.vector_store %arg11[%c0_21, %c0_22], %20 {strides = array<i32>} : memref<8x128xf32, #tpu.memory_space<vmem>>, vector<8x128xf32>,
    } else {
    }
    %c0 = arith.constant 0 : index
    %c0_1 = arith.constant 0 : index
    %3 = vector.load %arg4[%c0, %c0_1] : memref<8x128xf32, #tpu.memory_space<vmem>>, vector<8x128xf32>
    %c0_2 = arith.constant 0 : index
    %c0_3 = arith.constant 0 : index
    %4 = vector.load %arg10[%c0_2, %c0_3] : memref<8x128xf32, #tpu.memory_space<vmem>>, vector<8x128xf32>
    %c0_4 = arith.constant 0 : index
    %c0_5 = arith.constant 0 : index
    %5 = vector.load %arg5[%c0_4, %c0_5] : memref<128x128xf32, #tpu.memory_space<vmem>>, vector<128x128xf32>
    %cst = arith.constant dense<0.000000e+00> : vector<8x128xf32>
    %6 = tpu.matmul %3, %5, %cst {dimension_numbers = #tpu.dot_dimension_numbers<[1], [0], [0], [1], [0, 0, 1, 1], [], []>} : vector<8x128xf32>, vector<128x128xf32>, vector<8x128xf32> -> vector<8x128xf32>
    %7 = arith.addf %4, %6 : vector<8x128xf32>
    %c0_6 = arith.constant 0 : index
    %c0_7 = arith.constant 0 : index
    %8 = vector.load %arg10[%c0_6, %c0_7] : memref<8x128xf32, #tpu.memory_space<vmem>>, vector<8x128xf32>
    tpu.vector_store %arg10[%c0_6, %c0_7], %7 {strides = array<i32>} : memref<8x128xf32, #tpu.memory_space<vmem>>, vector<8x128xf32>,
    %c0_8 = arith.constant 0 : index
    %c0_9 = arith.constant 0 : index
    %9 = vector.load %arg11[%c0_8, %c0_9] : memref<8x128xf32, #tpu.memory_space<vmem>>, vector<8x128xf32>
    %10 = arith.mulf %3, %3 : vector<8x128xf32>
    %c0_10 = arith.constant 0 : index
    %c0_11 = arith.constant 0 : index
    %11 = vector.load %arg6[%c0_10, %c0_11] : memref<128x128xf32, #tpu.memory_space<vmem>>, vector<128x128xf32>
    %cst_12 = arith.constant dense<0.000000e+00> : vector<8x128xf32>
    %12 = tpu.matmul %10, %11, %cst_12 {dimension_numbers = #tpu.dot_dimension_numbers<[1], [0], [0], [1], [0, 0, 1, 1], [], []>} : vector<8x128xf32>, vector<128x128xf32>, vector<8x128xf32> -> vector<8x128xf32>
    %13 = arith.addf %9, %12 : vector<8x128xf32>
    %c0_13 = arith.constant 0 : index
    %c0_14 = arith.constant 0 : index
    %14 = vector.load %arg11[%c0_13, %c0_14] : memref<8x128xf32, #tpu.memory_space<vmem>>, vector<8x128xf32>
    tpu.vector_store %arg11[%c0_13, %c0_14], %13 {strides = array<i32>} : memref<8x128xf32, #tpu.memory_space<vmem>>, vector<8x128xf32>,
    %c0_i32_15 = arith.constant 0 : i32
    %15 = arith.cmpi eq, %arg2, %c0_i32_15 : i32
    %16 = arith.extui %15 : i1 to i32
    %c0_i32_16 = arith.constant 0 : i32
    %17 = arith.cmpi ne, %16, %c0_i32_16 : i32
    scf.if %17 {
      %c0_17 = arith.constant 0 : index
      %18 = memref.load %arg3[%c0_17] : memref<1xf32, #tpu.memory_space<smem>>
      %c0_18 = arith.constant 0 : index
      %c0_19 = arith.constant 0 : index
      %19 = vector.load %arg7[%c0_18, %c0_19] : memref<1x128xf32, #tpu.memory_space<vmem>>, vector<1x128xf32>
      %c0_20 = arith.constant 0 : index
      %c0_21 = arith.constant 0 : index
      %20 = vector.load %arg10[%c0_20, %c0_21] : memref<8x128xf32, #tpu.memory_space<vmem>>, vector<8x128xf32>
      %21 = vector.broadcast %19 : vector<1x128xf32> to vector<8x128xf32>
      %22 = arith.addf %20, %21 : vector<8x128xf32>
      %c0_22 = arith.constant 0 : index
      %c0_23 = arith.constant 0 : index
      %23 = vector.load %arg11[%c0_22, %c0_23] : memref<8x128xf32, #tpu.memory_space<vmem>>, vector<8x128xf32>
      %24 = arith.mulf %19, %19 : vector<1x128xf32>
      %25 = vector.broadcast %24 : vector<1x128xf32> to vector<8x128xf32>
      %26 = arith.addf %23, %25 : vector<8x128xf32>
      %27 = vector.broadcast %18 : f32 to vector<8x128xf32>
      %28 = arith.mulf %27, %26 : vector<8x128xf32>
      %cst_24 = arith.constant 1.000000e-18 : f32
      %29 = vector.broadcast %cst_24 : f32 to vector<8x128xf32>
      %30 = arith.addf %28, %29 : vector<8x128xf32>
      %31 = math.sqrt %30 : vector<8x128xf32>
      %c0_25 = arith.constant 0 : index
      %c0_26 = arith.constant 0 : index
      %32 = vector.load %arg8[%c0_25, %c0_26] : memref<8x128xf32, #tpu.memory_space<vmem>>, vector<8x128xf32>
      %33 = arith.mulf %31, %32 : vector<8x128xf32>
      %34 = arith.addf %22, %33 : vector<8x128xf32>
      %c0_27 = arith.constant 0 : index
      %c0_28 = arith.constant 0 : index
      %35 = vector.load %arg9[%c0_27, %c0_28] : memref<8x128xf32, #tpu.memory_space<vmem>>, vector<8x128xf32>
      tpu.vector_store %arg9[%c0_27, %c0_28], %34 {strides = array<i32>} : memref<8x128xf32, #tpu.memory_space<vmem>>, vector<8x128xf32>,
    } else {
    }
    return
  }
  func.func @transform_0(%arg0: i32, %arg1: i32, %arg2: i32) -> i32 {
    %c0_i32 = arith.constant 0 : i32
    %c0_i32_0 = arith.constant 0 : i32
    return %c0_i32 : i32
  }
  func.func @transform_1(%arg0: i32, %arg1: i32, %arg2: i32) -> (i32, i32) {
    %c0_i32 = arith.constant 0 : i32
    return %arg0, %arg2 : i32, i32
  }
  func.func @transform_2(%arg0: i32, %arg1: i32, %arg2: i32) -> (i32, i32) {
    %c0_i32 = arith.constant 0 : i32
    return %arg2, %arg1 : i32, i32
  }
  func.func @transform_3(%arg0: i32, %arg1: i32, %arg2: i32) -> (i32, i32) {
    %c0_i32 = arith.constant 0 : i32
    return %arg2, %arg1 : i32, i32
  }
  func.func @transform_4(%arg0: i32, %arg1: i32, %arg2: i32) -> (i32, i32) {
    %c0_i32 = arith.constant 0 : i32
    %c0_i32_0 = arith.constant 0 : i32
    return %c0_i32, %arg1 : i32, i32
  }
  func.func @transform_5(%arg0: i32, %arg1: i32, %arg2: i32) -> (i32, i32) {
    %c0_i32 = arith.constant 0 : i32
    return %arg0, %arg1 : i32, i32
  }
  func.func @transform_6(%arg0: i32, %arg1: i32, %arg2: i32) -> (i32, i32) {
    %c0_i32 = arith.constant 0 : i32
    return %arg0, %arg1 : i32, i32
  }
}

</mosaic_0001>

<bundles_post_ra>
// kernel: ard_vd_linear.1
= control target key start
LH: loop header
LB: loop body
LE: loop exit
PB: predicated region body
PF: predicated region fallthrough
CT: control target
= control target key end

     0   :  { %v443_v3 = vmov 0.0|0.0   ;;  %vm444_vm0 = vmmov 0   ;;  %v445_v6 = vmov 0.0   ;;  %s618_s0 = inlined_call_operand.<no memory space> [shape: f32[1], index: 0, kind: input, shape index: {}]   ;;  %s619_s1 = inlined_call_operand.vmem [shape: f32[8,128], index: 1, kind: input, shape index: {}]   ;;  %s620_s2 = inlined_call_operand.vmem [shape: f32[128,128], index: 2, kind: input, shape index: {}]   ;;  %s621_s3 = inlined_call_operand.vmem [shape: f32[128,128], index: 3, kind: input, shape index: {}]   ;;  %s622_s4 = inlined_call_operand.vmem [shape: f32[1,128], index: 4, kind: input, shape index: {}]   ;;  %s623_s5 = inlined_call_operand.vmem [shape: f32[8,128], index: 5, kind: input, shape index: {}]   ;;  %s624_s6 = inlined_call_operand.hbm [shape: f32[8,128], index: 6, kind: output, shape index: {}]  }
   0x1   :  { %v123_v0 = vld [vmem:[%s621_s3] sm:$0xff]  ;;  %v124_v1 = vld [vmem:[%s621_s3 + $0x8] sm:$0xff]  ;;  %v125_v2 = vld [vmem:[%s621_s3 + $0x10] sm:$0xff]  ;;  %389 = vmatprep.subr.bf16.mxu1 %v443_v3  ;;  %365 = vmatprep.subr.bf16.mxu0 %v443_v3 }
   0x2   :  { %v390_v4 = vpack.c.bf16 %v124_v1, %v123_v0  ;;  %v126_v5 = vld [vmem:[%s621_s3 + $0x18] sm:$0xff]  ;;  %362 = vmatprep.mubr.msk.f32.mxu1 %vm444_vm0, %v445_v6  ;;  %327 = vmatprep.mubr.msk.f32.mxu0 %vm444_vm0, %v445_v6  ;;  %v33_v8 = vld [vmem:[%s620_s2] sm:$0xff]  ;;  %v34_v9 = vld [vmem:[%s620_s2 + $0x8] sm:$0xff] }
   0x3   :  { %v393_v7 = vpack.c.bf16 %v126_v5, %v125_v2  ;;  %v127_v10 = vld [vmem:[%s621_s3 + $0x20] sm:$0xff]  ;;  %v128_v11 = vld [vmem:[%s621_s3 + $0x28] sm:$0xff]  ;;  %v366_v12 = vpack.c.bf16 %v34_v9, %v33_v8  ;;  %v35_v13 = vld [vmem:[%s620_s2 + $0x10] sm:$0xff] }
   0x4   :  { %391 = vmatpush3.bf16.msra.mxu1 %v390_v4  ;;  %v36_v14 = vld [vmem:[%s620_s2 + $0x18] sm:$0xff]  ;;  %v396_v16 = vpack.c.bf16 %v128_v11, %v127_v10  ;;  %v37_v17 = vld [vmem:[%s620_s2 + $0x20] sm:$0xff]  ;;  %v38_v18 = vld [vmem:[%s620_s2 + $0x28] sm:$0xff] }
   0x5   :  { %392 = vmatprep.subr.bf16.mxu1 %v443_v3  ;;  %367 = vmatpush3.bf16.msra.mxu0 %v366_v12  ;;  %v369_v15 = vpack.c.bf16 %v36_v14, %v35_v13  ;;  %v129_v19 = vld [vmem:[%s621_s3 + $0x30] sm:$0xff]  ;;  %v130_v20 = vld [vmem:[%s621_s3 + $0x38] sm:$0xff]  ;;  %v372_v21 = vpack.c.bf16 %v38_v18, %v37_v17 }
   0x6   :  { %368 = vmatprep.subr.bf16.mxu0 %v443_v3  ;;  %v399_v22 = vpack.c.bf16 %v130_v20, %v129_v19  ;;  %v39_v23 = vld [vmem:[%s620_s2 + $0x30] sm:$0xff]  ;;  %v40_v24 = vld [vmem:[%s620_s2 + $0x38] sm:$0xff] }
   0x8   :  { %394 = vmatpush3.bf16.msra.mxu1 %v393_v7 }
   0x9   :  { %395 = vmatprep.subr.bf16.mxu1 %v443_v3  ;;  %370 = vmatpush3.bf16.msra.mxu0 %v369_v15 }
   0xa   :  { %371 = vmatprep.subr.bf16.mxu0 %v443_v3 }
   0xc   :  { %397 = vmatpush3.bf16.msra.mxu1 %v396_v16 }
   0xd   :  { %12 = vsyncpa [#allocation6], 0  ;;  %398 = vmatprep.subr.bf16.mxu1 %v443_v3  ;;  %v131_v25 = vld [vmem:[%s621_s3 + $0x40] sm:$0xff]  ;;  %v132_v26 = vld [vmem:[%s621_s3 + $0x48] sm:$0xff]  ;;  %373 = vmatpush3.bf16.msra.mxu0 %v372_v21  ;;  %v375_v27 = vpack.c.bf16 %v40_v24, %v39_v23  ;;  %v218_v52 = vlaneseq  ;;  %v233_v59 = vstv %s618_s0  ;;  %s446_s0 = smov [#allocation5]  }
   0xe   :  { %v402_v28 = vpack.c.bf16 %v132_v26, %v131_v25  ;;  %374 = vmatprep.subr.bf16.mxu0 %v443_v3  ;;  %v41_v29 = vld [vmem:[%s620_s2 + $0x40] sm:$0xff]  ;;  %v42_v30 = vld [vmem:[%s620_s2 + $0x48] sm:$0xff]  ;;  %v133_v31 = vld [vmem:[%s621_s3 + $0x50] sm:$0xff]  ;;  %s253_s17 = sshll.u32 %s446_s0, 4  ;;  %s254_s17 = int_to_ptr.vmem [resolvable:$true] %s253_s17 }
   0xf   :  { %v134_v32 = vld [vmem:[%s621_s3 + $0x58] sm:$0xff]  ;;  %v378_v33 = vpack.c.bf16 %v42_v30, %v41_v29  ;;  %v43_v35 = vld [vmem:[%s620_s2 + $0x50] sm:$0xff]  ;;  %v135_v37 = vld [vmem:[%s621_s3 + $0x60] sm:$0xff]  ;;  %v219_v53 = vshrl.u32 %v218_v52, 7  ;;  %s419_s18 = scalar_lea.vmem %s254_s17, 128  ;;  %p424_p1 = scmp.lt.s32.totalorder %s254_s17, %s254_s17 }
  0x10   :  { %400 = vmatpush3.bf16.msra.mxu1 %v399_v22  ;;  %v405_v34 = vpack.c.bf16 %v134_v32, %v133_v31  ;;  %v44_v36 = vld [vmem:[%s620_s2 + $0x58] sm:$0xff]  ;;  %v136_v38 = vld [vmem:[%s621_s3 + $0x68] sm:$0xff]  ;;  %v45_v41 = vld [vmem:[%s620_s2 + $0x60] sm:$0xff]  ;;  %p420_p0 = scmp.ne.s32.totalorder %s254_s17, %s419_s18  ;;  %p425_p2 = scmp.lt.s32.totalorder %s419_s18, %s419_s18 }
  0x11   :  { %401 = vmatprep.subr.bf16.mxu1 %v443_v3  ;;  %376 = vmatpush3.bf16.msra.mxu0 %v375_v27  ;;  %v381_v39 = vpack.c.bf16 %v44_v36, %v43_v35  ;;  %v408_v40 = vpack.c.bf16 %v136_v38, %v135_v37  ;;  %v46_v42 = vld [vmem:[%s620_s2 + $0x68] sm:$0xff]  ;;  %v137_v43 = vld [vmem:[%s621_s3 + $0x70] sm:$0xff]  ;;  %v138_v44 = vld [vmem:[%s621_s3 + $0x78] sm:$0xff]  ;;  %v220_v55 = vsub.s32 0, %v219_v53 }
  0x12   :  { %377 = vmatprep.subr.bf16.mxu0 %v443_v3  ;;  %v384_v45 = vpack.c.bf16 %v46_v42, %v45_v41  ;;  %v411_v46 = vpack.c.bf16 %v138_v44, %v137_v43  ;;  %v31_v47 = vld [vmem:[%s619_s1] sm:$0xff]  ;;  %v47_v48 = vld [vmem:[%s620_s2 + $0x70] sm:$0xff]  ;;  %v48_v49 = vld [vmem:[%s620_s2 + $0x78] sm:$0xff]  ;;  %p426_p3 = por %p425_p2, %p424_p1 }
  0x13   :  { %v122_v50 = vmul.f32 %v31_v47, %v31_v47  ;;  %v387_v51 = vpack.c.bf16 %v48_v49, %v47_v48  ;;  %v215_v54 = vld [vmem:[%s622_s4] sm:$0x1] }
  0x14   :  { %403 = vmatpush3.bf16.msra.mxu1 %v402_v28  ;;  %v225_v56 = vmul.f32 %v215_v54, %v215_v54  ;;  %v221_v2 = vrot.slane %v215_v54, %v220_v55  ;;  %v243_v6 = vld [vmem:[%s623_s5] sm:$0xff]  ;;  %p427_p4 = pnand %p426_p3, %p420_p0 }
  0x15   :  { %404 = vmatprep.subr.bf16.mxu1 %v443_v3  ;;  %379 = vmatpush3.bf16.msra.mxu0 %v378_v33 }
  0x16   :  { %380 = vmatprep.subr.bf16.mxu0 %v443_v3  ;;  %v230_v57 = vrot.slane %v225_v56, %v220_v55 }
  0x18   :  { %406 = vmatpush3.bf16.msra.mxu1 %v405_v34 }
  0x19   :  { %407 = vmatprep.subr.bf16.mxu1 %v443_v3  ;;  %382 = vmatpush3.bf16.msra.mxu0 %v381_v39 }
  0x1a   :  { %383 = vmatprep.subr.bf16.mxu0 %v443_v3 }
  0x1c   :  { %409 = vmatpush3.bf16.msra.mxu1 %v408_v40 }
  0x1d   :  { %410 = vmatprep.subr.bf16.mxu1 %v443_v3  ;;  %385 = vmatpush3.bf16.msra.mxu0 %v384_v45 }
  0x1e   :  { %386 = vmatprep.subr.bf16.mxu0 %v443_v3 }
  0x20   :  { %412 = vmatpush3.bf16.msra.mxu1 %v411_v46 }
  0x21   :  { %388 = vmatpush3.bf16.msra.mxu0 %v387_v51 }
  0x23   :  { %363 = vmatmul.mubr.f32.vlgmr.msra.gmra.mrb[0].mxu1 %v122_v50 }
  0x24   :  { %328 = vmatmul.mubr.f32.vlgmr.msra.gmra.mrb[0].mxu0 %v31_v47 }
  0xf6   :  { %v205_v58 = vpop.f32.mrb[0].mxu1 }
  0xf7   :  { %v232_v60 = vadd.f32 %v230_v57, %v205_v58  ;;  %v364_v61 = vpop.f32.mrb[1].mxu1  ;;  %v115_v63 = vpop.f32.mrb[0].mxu0 }
  0xf8   :  { %v329_v0 = vpop.f32.mrb[1].mxu0  ;;  %v223_v7 = vadd.f32 %v221_v2, %v115_v63 }
  0xf9   :  { %v234_v62 = vmul.f32 %v233_v59, %v232_v60 }
  0xfb   :  { %v235_v1 = vadd.f32 1e-18, %v234_v62 }
  0xfd   :  { %417 = vrsqrt.f32 %v235_v1  ;;  %vm238_vm1 = vcmp.eq.f32.partialorder %v235_v1, inf  ;;  %v241_v5 = vand.u32 2147483648, %v235_v1  ;;  %vm240_vm2 = vcmp.eq.f32.partialorder %v235_v1, 0.0 }
 0x107   :  { %v418_v3 = vpop.eup %417 }
 0x108   :  { %v237_v4 = vmul.f32 %v418_v3, %v235_v1 }
 0x10a   :  { %v239_v8 = vsel %vm238_vm1, %v235_v1, %v237_v4 }
 0x10b   :  { %v242_v9 = vsel %vm240_vm2, %v241_v5, %v239_v8 }
 0x10c   :  { %v244_v10 = vmul.f32 %v243_v6, %v242_v9 }
 0x10e   :  { %v245_v11 = vadd.f32 %v244_v10, %v223_v7 }
 0x110   :  { %246 = vst [vmem:[#allocation5] sm:$0xff] %v245_v11 }
 0x111   :  { %430 = shalt.err (!%p427_p4)
}
 0x112   :  { %s431_s5 = scalar_lea.hbm %s624_s6, 128 }
 0x113   :  { %p432_p5 = scmp.ne.s32.totalorder %s624_s6, %s431_s5  ;;  %p435_p6 = scmp.lt.u32.totalorder %s431_s5, %s624_s6 }
 0x115   :  { %p437_p7 = pnand %p435_p6, %p432_p5 }
 0x117   :  { %440 = shalt.err (!%p437_p7)
}
 0x118   :  { %256 = dma.vmem_to_hbm [thread:$0]  %s254_s17, 128, %s624_s6, [#allocation6]  }
 0x119   :  { %441 = dma.done.wait [#allocation6], 128  }
 0x11a   :  { %442 = vsyncadd [#allocation6], 4294967168 }
 0x11b   :  { %260 = vsyncpa [#allocation6], 1 }

</bundles_post_ra>
